<compile_context>
chip_gen: v6e
topology: v6e:2x2x1
jax: 0.10.0
libtpu: 0.0.40
codegen_flags: <defaults>
</compile_context>

<pallas_src>
import functools

import jax
import jax.numpy as jnp
from jax import lax
from jax.experimental import pallas as pl
from jax.experimental.pallas import tpu as pltpu


def _round_up(x, m):
    return ((x + m - 1) // m) * m


def _pick_tn(I, cap=1024):
    """Largest multiple of 128 <= cap that divides I (avoids per-call W/b padding)."""
    for cand in range(cap, 0, -128):
        if I % cand == 0:
            return cand
    return min(cap, _round_up(I, 128))


def _intermediate_kernel(x_ref, w_ref, b_ref, o_ref, *, tn, resident_w, approximate):
    # x_ref: (tm, H)
    # w_ref: (H, Ip) resident   OR   (H, tn) streamed tile      (already transposed)
    # b_ref: (Ip//tn, tn) resident, f32
    # o_ref: (tm, tn)
    j = pl.program_id(1)

    if resident_w:
        col = pl.multiple_of(j * tn, 128)      # 128-aligned lane offset -> cheap view
        w = w_ref[:, pl.ds(col, tn)]           # (H, tn)
    else:
        w = w_ref[...]                          # (H, tn)

    x = x_ref[...]
    if x.dtype != w.dtype:                      # no-op: wrapper pre-casts x
        x = x.astype(w.dtype)

    # Plain (M,K)x(K,N) contraction; f32 accumulation on the MXU.
    y = jnp.dot(x, w, preferred_element_type=jnp.float32)      # (tm, tn) f32
    y = y + b_ref[pl.ds(j, 1), :]                                # (1, tn) f32 bias

    if approximate:
        # tanh GELU (EUP) — opt-in fast path for bf16 compute.
        c = jnp.float32(0.7978845608028654)     # sqrt(2/pi)
        g = 0.5 * y * (1.0 + jnp.tanh(c * (y + 0.044715 * y * y * y)))
    else:
        # Exact GELU: 0.5 * y * (1 + erf(y / sqrt(2)))  == torch F.gelu default.
        g = 0.5 * y * (1.0 + lax.erf(y * jnp.float32(0.7071067811865476)))

    o_ref[...] = g.astype(o_ref.dtype)


def layoutlmv2_intermediate(hidden_states, weight, bias, *, tm=None, tn=None,
                            compute_dtype=jnp.bfloat16, approximate_gelu=False):
    """hidden_states: (B, S, H)
       weight: (I, H)   (PyTorch nn.Linear layout: out_features x in_features)
       bias:   (I,)
       compute_dtype: matmul operand dtype (default bf16; f32 accumulation always).
                      Use jnp.float32 (or None) for the exactness path.
       approximate_gelu: tanh-GELU instead of exact erf (perf option for bf16)."""
    B, S, H = hidden_states.shape
    I = weight.shape[0]
    M = B * S
    out_dtype = hidden_states.dtype

    # --- tile selection --------------------------------------------------------
    if tn is None:
        tn = _pick_tn(I, cap=1024)
    if tm is None:
        tm = min(512, _round_up(M, 8))
    Mp = _round_up(M, tm)
    Ip = _round_up(I, tn)          # == I whenever tn divides I (the common case)
    nJ = Ip // tn

    # --- prepare operands ------------------------------------------------------
    x2d = hidden_states.reshape(M, H)
    if compute_dtype is not None and x2d.dtype != compute_dtype:
        x2d = x2d.astype(compute_dtype)        # cast once: halves x DMA + no per-step VPU cast
    if Mp != M:
        x2d = jnp.pad(x2d, ((0, Mp - M), (0, 0)))

    w_arr, b_arr = weight, bias
    if Ip != I:                                 # avoided when tn divides I
        w_arr = jnp.pad(w_arr, ((0, Ip - I), (0, 0)))
        b_arr = jnp.pad(b_arr, ((0, Ip - I),))
    if compute_dtype is not None and w_arr.dtype != compute_dtype:
        w_arr = w_arr.astype(compute_dtype)     # halves resident-W VMEM + DMA
    # One-time transpose (wrapper side) -> plain (K,N) RHS; no per-step transpose risk.
    # TODO(synk): in a real model, store params pre-transposed / pre-cast to skip this per call.
    w_t = w_arr.T                                # (H, Ip)
    b2d = b_arr.reshape(nJ, tn).astype(jnp.float32)

    # --- VMEM budget / weight residency decision --------------------------------
    bpe_x = jnp.dtype(x2d.dtype).itemsize
    bpe_w = jnp.dtype(w_t.dtype).itemsize
    bpe_o = jnp.dtype(out_dtype).itemsize
    try:
        phys = int(pltpu.get_tpu_info().vmem_capacity_bytes)
    except Exception:
        phys = 64 * 1024 * 1024                 # conservative (v7x per-core)
    vmem_cap = min(int(phys * 0.85), 100 * 1024 * 1024)   # headroom on v7x, <=100MiB on v5e/v6e

    w_bytes = H * Ip * bpe_w
    resident_w = w_bytes <= vmem_cap // 2        # else stream (H, tn) tiles (e.g. huge f32 on v7x)

    grid = (Mp // tm, nJ)
    kernel = functools.partial(_intermediate_kernel, tn=tn,
                               resident_w=resident_w, approximate=approximate_gelu)

    def make_call(single_buffer_resident):
        if resident_w:
            wkw = dict(pipeline_mode=pl.Buffered(1)) if single_buffer_resident else {}
            w_spec = pl.BlockSpec((H, Ip), lambda i, j: (0, 0), **wkw)
            w_buf_bytes = (1 if single_buffer_resident else 2) * w_bytes
        else:
            w_spec = pl.BlockSpec((H, tn), lambda i, j: (0, j))
            w_buf_bytes = 2 * H * tn * bpe_w
        bkw = dict(pipeline_mode=pl.Buffered(1)) if single_buffer_resident else {}
        b_spec = pl.BlockSpec((nJ, tn), lambda i, j: (0, 0), **bkw)

        est = (2 * tm * H * bpe_x               # x tiles (double-buffered)
               + w_buf_bytes                    # weight
               + 2 * nJ * tn * 4                # bias
               + 2 * tm * tn * bpe_o)           # output tiles (double-buffered)
        vmem_limit = int(min(max(int(est * 1.25), 32 * 1024 * 1024), vmem_cap))

        return pl.pallas_call(
            kernel,
            out_shape=jax.ShapeDtypeStruct((Mp, Ip), out_dtype),
            grid_spec=pltpu.PrefetchScalarGridSpec(
                num_scalar_prefetch=0,
                grid=grid,
                in_specs=[
                    # x row tile: resident across the inner (j) sweep.
                    pl.BlockSpec((tm, H), lambda i, j: (i, 0)),
                    w_spec,
                    b_spec,
                ],
                out_specs=pl.BlockSpec((tm, tn), lambda i, j: (i, j)),
            ),
            compiler_params=pltpu.CompilerParams(
                dimension_semantics=("parallel", "parallel"),
                vmem_limit_bytes=vmem_limit,
            ),
        )

    try:
        out = make_call(True)(x2d, w_t, b2d)
    except Exception:
        # If single-buffering via pl.Buffered(1) is unsupported, fall back to defaults.
        out = make_call(False)(x2d, w_t, b2d)

    if Mp != M or Ip != I:
        out = out[:M, :I]
    return out.reshape(B, S, I)


if __name__ == "__main__":
    # Small config consistent with the module: hidden_size=128, intermediate_size=512.
    B, S, H, I = 2, 8, 128, 512

    key = jax.random.PRNGKey(0)
    kx, kw, kb = jax.random.split(key, 3)
    hidden_states = jax.random.normal(kx, (B, S, H), dtype=jnp.float32)
    weight = jax.random.normal(kw, (I, H), dtype=jnp.float32) * 0.02   # nn.Linear W (I, H)
    bias = jax.random.normal(kb, (I,), dtype=jnp.float32) * 0.02       # nn.Linear b (I,)

    # Reference in plain JAX (exact-erf GELU == torch F.gelu default).
    ref = jax.nn.gelu(hidden_states @ weight.T + bias, approximate=False)

    # Exactness path (f32 matmul): matches the PyTorch module semantics tightly.
    out_f32 = layoutlmv2_intermediate(hidden_states, weight, bias,
                                      compute_dtype=jnp.float32)
    jax.block_until_ready(out_f32)
    assert out_f32.shape == (B, S, I)
    assert jnp.allclose(out_f32, ref, atol=2e-5, rtol=2e-5)

    # Performance default (bf16 operands, f32 accumulation): looser tolerance.
    out_bf16 = layoutlmv2_intermediate(hidden_states, weight, bias)
    jax.block_until_ready(out_bf16)
    assert out_bf16.shape == (B, S, I)
    assert jnp.allclose(out_bf16, ref, atol=5e-2, rtol=5e-2)

    print("KERNEL_OK")
</pallas_src>

<mosaic_0001>
module attributes {stable_mosaic.version = 11 : i64} {
  func.func @_intermediate_kernel(%arg0: i32, %arg1: i32, %arg2: memref<16x128xf32, #tpu.memory_space<vmem>>, %arg3: memref<128x512xf32, #tpu.memory_space<vmem>>, %arg4: memref<1x512xf32, #tpu.memory_space<vmem>>, %arg5: memref<16x512xf32, #tpu.memory_space<vmem>>) attributes {dimension_semantics = [#tpu.dimension_semantics<parallel>, #tpu.dimension_semantics<parallel>], iteration_bounds = array<i64: 1, 1>, scalar_prefetch = 0 : i64, scratch_operands = 0 : i64, tpu.core_type = #tpu.core_type<tc>, window_params = [{transform_indices = @transform_0, window_bounds = array<i64: 16, 128>}, {pipeline_mode = #tpu.pipeline_mode<synchronous>, transform_indices = @transform_1, window_bounds = array<i64: 128, 512>}, {pipeline_mode = #tpu.pipeline_mode<synchronous>, transform_indices = @transform_2, window_bounds = array<i64: 1, 512>}, {transform_indices = @transform_3, window_bounds = array<i64: 16, 512>}]} {
    %c512_i32 = arith.constant 512 : i32
    %0 = arith.muli %arg1, %c512_i32 : i32
    %1 = tpu.assume_multiple %0, 128 : i32
    %c0 = arith.constant 0 : index
    %2 = arith.index_cast %1 : i32 to index
    %3 = vector.load %arg3[%c0, %2] : memref<128x512xf32, #tpu.memory_space<vmem>>, vector<128x512xf32>
    %c0_0 = arith.constant 0 : index
    %c0_1 = arith.constant 0 : index
    %4 = vector.load %arg2[%c0_0, %c0_1] : memref<16x128xf32, #tpu.memory_space<vmem>>, vector<16x128xf32>
    %cst = arith.constant dense<0.000000e+00> : vector<16x512xf32>
    %5 = tpu.matmul %4, %3, %cst {dimension_numbers = #tpu.dot_dimension_numbers<[1], [0], [0], [1], [0, 0, 1, 1], [], []>} : vector<16x128xf32>, vector<128x512xf32>, vector<16x512xf32> -> vector<16x512xf32>
    %6 = arith.index_cast %arg1 : i32 to index
    %c0_2 = arith.constant 0 : index
    %7 = vector.load %arg4[%6, %c0_2] : memref<1x512xf32, #tpu.memory_space<vmem>>, vector<1x512xf32>
    %8 = vector.broadcast %7 : vector<1x512xf32> to vector<16x512xf32>
    %9 = arith.addf %5, %8 : vector<16x512xf32>
    %cst_3 = arith.constant 5.000000e-01 : f32
    %10 = vector.broadcast %cst_3 : f32 to vector<16x512xf32>
    %11 = arith.mulf %10, %9 : vector<16x512xf32>
    %cst_4 = arith.constant 0.707106769 : f32
    %12 = vector.broadcast %cst_4 : f32 to vector<16x512xf32>
    %13 = arith.mulf %9, %12 : vector<16x512xf32>
    %14 = math.erf %13 : vector<16x512xf32>
    %cst_5 = arith.constant 1.000000e+00 : f32
    %15 = vector.broadcast %cst_5 : f32 to vector<16x512xf32>
    %16 = arith.addf %15, %14 : vector<16x512xf32>
    %17 = arith.mulf %11, %16 : vector<16x512xf32>
    %c0_6 = arith.constant 0 : index
    %c0_7 = arith.constant 0 : index
    %18 = vector.load %arg5[%c0_6, %c0_7] : memref<16x512xf32, #tpu.memory_space<vmem>>, vector<16x512xf32>
    tpu.vector_store %arg5[%c0_6, %c0_7], %17 {strides = array<i32>} : memref<16x512xf32, #tpu.memory_space<vmem>>, vector<16x512xf32>,
    return
  }
  func.func @transform_0(%arg0: i32, %arg1: i32) -> (i32, i32) {
    %c0_i32 = arith.constant 0 : i32
    %c0_i32_0 = arith.constant 0 : i32
    return %arg0, %c0_i32 : i32, i32
  }
  func.func @transform_1(%arg0: i32, %arg1: i32) -> (i32, i32) {
    %c0_i32 = arith.constant 0 : i32
    %c0_i32_0 = arith.constant 0 : i32
    %c0_i32_1 = arith.constant 0 : i32
    return %c0_i32, %c0_i32_0 : i32, i32
  }
  func.func @transform_2(%arg0: i32, %arg1: i32) -> (i32, i32) {
    %c0_i32 = arith.constant 0 : i32
    %c0_i32_0 = arith.constant 0 : i32
    %c0_i32_1 = arith.constant 0 : i32
    return %c0_i32, %c0_i32_0 : i32, i32
  }
  func.func @transform_3(%arg0: i32, %arg1: i32) -> (i32, i32) {
    %c0_i32 = arith.constant 0 : i32
    return %arg0, %arg1 : i32, i32
  }
}

module attributes {stable_mosaic.version = 11 : i64} {
  func.func @_intermediate_kernel(%arg0: i32, %arg1: i32, %arg2: memref<16x128xf32, #tpu.memory_space<vmem>>, %arg3: memref<128x512xf32, #tpu.memory_space<vmem>>, %arg4: memref<1x512xf32, #tpu.memory_space<vmem>>, %arg5: memref<16x512xf32, #tpu.memory_space<vmem>>) attributes {dimension_semantics = [#tpu.dimension_semantics<parallel>, #tpu.dimension_semantics<parallel>], iteration_bounds = array<i64: 1, 1>, scalar_prefetch = 0 : i64, scratch_operands = 0 : i64, tpu.core_type = #tpu.core_type<tc>, window_params = [{transform_indices = @transform_0, window_bounds = array<i64: 16, 128>}, {pipeline_mode = #tpu.pipeline_mode<synchronous>, transform_indices = @transform_1, window_bounds = array<i64: 128, 512>}, {pipeline_mode = #tpu.pipeline_mode<synchronous>, transform_indices = @transform_2, window_bounds = array<i64: 1, 512>}, {transform_indices = @transform_3, window_bounds = array<i64: 16, 512>}]} {
    %c512_i32 = arith.constant 512 : i32
    %0 = arith.muli %arg1, %c512_i32 : i32
    %1 = tpu.assume_multiple %0, 128 : i32
    %c0 = arith.constant 0 : index
    %2 = arith.index_cast %1 : i32 to index
    %3 = vector.load %arg3[%c0, %2] : memref<128x512xf32, #tpu.memory_space<vmem>>, vector<128x512xf32>
    %c0_0 = arith.constant 0 : index
    %c0_1 = arith.constant 0 : index
    %4 = vector.load %arg2[%c0_0, %c0_1] : memref<16x128xf32, #tpu.memory_space<vmem>>, vector<16x128xf32>
    %cst = arith.constant dense<0.000000e+00> : vector<16x512xf32>
    %5 = tpu.matmul %4, %3, %cst {dimension_numbers = #tpu.dot_dimension_numbers<[1], [0], [0], [1], [0, 0, 1, 1], [], []>} : vector<16x128xf32>, vector<128x512xf32>, vector<16x512xf32> -> vector<16x512xf32>
    %6 = arith.index_cast %arg1 : i32 to index
    %c0_2 = arith.constant 0 : index
    %7 = vector.load %arg4[%6, %c0_2] : memref<1x512xf32, #tpu.memory_space<vmem>>, vector<1x512xf32>
    %8 = vector.broadcast %7 : vector<1x512xf32> to vector<16x512xf32>
    %9 = arith.addf %5, %8 : vector<16x512xf32>
    %cst_3 = arith.constant 5.000000e-01 : f32
    %10 = vector.broadcast %cst_3 : f32 to vector<16x512xf32>
    %11 = arith.mulf %10, %9 : vector<16x512xf32>
    %cst_4 = arith.constant 0.707106769 : f32
    %12 = vector.broadcast %cst_4 : f32 to vector<16x512xf32>
    %13 = arith.mulf %9, %12 : vector<16x512xf32>
    %14 = math.erf %13 : vector<16x512xf32>
    %cst_5 = arith.constant 1.000000e+00 : f32
    %15 = vector.broadcast %cst_5 : f32 to vector<16x512xf32>
    %16 = arith.addf %15, %14 : vector<16x512xf32>
    %17 = arith.mulf %11, %16 : vector<16x512xf32>
    %c0_6 = arith.constant 0 : index
    %c0_7 = arith.constant 0 : index
    %18 = vector.load %arg5[%c0_6, %c0_7] : memref<16x512xf32, #tpu.memory_space<vmem>>, vector<16x512xf32>
    tpu.vector_store %arg5[%c0_6, %c0_7], %17 {strides = array<i32>} : memref<16x512xf32, #tpu.memory_space<vmem>>, vector<16x512xf32>,
    return
  }
  func.func @transform_0(%arg0: i32, %arg1: i32) -> (i32, i32) {
    %c0_i32 = arith.constant 0 : i32
    %c0_i32_0 = arith.constant 0 : i32
    return %arg0, %c0_i32 : i32, i32
  }
  func.func @transform_1(%arg0: i32, %arg1: i32) -> (i32, i32) {
    %c0_i32 = arith.constant 0 : i32
    %c0_i32_0 = arith.constant 0 : i32
    %c0_i32_1 = arith.constant 0 : i32
    return %c0_i32, %c0_i32_0 : i32, i32
  }
  func.func @transform_2(%arg0: i32, %arg1: i32) -> (i32, i32) {
    %c0_i32 = arith.constant 0 : i32
    %c0_i32_0 = arith.constant 0 : i32
    %c0_i32_1 = arith.constant 0 : i32
    return %c0_i32, %c0_i32_0 : i32, i32
  }
  func.func @transform_3(%arg0: i32, %arg1: i32) -> (i32, i32) {
    %c0_i32 = arith.constant 0 : i32
    return %arg0, %arg1 : i32, i32
  }
}

</mosaic_0001>

<bundles_post_ra>
// kernel: tpu_custom_call.1
= control target key start
LH: loop header
LB: loop body
LE: loop exit
PB: predicated region body
PF: predicated region fallthrough
CT: control target
= control target key end

     0   :  { %8 = vsyncpa [#allocation3], 0  ;;  %s533_s0 = inlined_call_operand.hbm [shape: f32[16,128], index: 0, kind: input, shape index: {}]   ;;  %s534_s1 = inlined_call_operand.hbm [shape: f32[128,512], index: 1, kind: input, shape index: {}]   ;;  %s535_s2 = inlined_call_operand.hbm [shape: f32[1,512], index: 2, kind: input, shape index: {}]   ;;  %s536_s3 = inlined_call_operand.hbm [shape: f32[16,512], index: 3, kind: output, shape index: {}]  }
   0x1   :  { %9 = vsyncpa [#allocation6], 0 }
   0x2   :  { %10 = vsyncpa [#allocation4], 0  ;;  %s482_s12 = smov [#allocation5]  }
   0x3   :  { %s28_s13 = sshll.u32 %s482_s12, 4  ;;  %s29_s13 = int_to_ptr.vmem [resolvable:$true] %s28_s13 }
   0x4   :  { %s404_s14 = scalar_lea.vmem %s29_s13, 8192  ;;  %p409_p1 = scmp.lt.s32.totalorder %s29_s13, %s29_s13 }
   0x5   :  { %p405_p0 = scmp.ne.s32.totalorder %s29_s13, %s404_s14  ;;  %p410_p2 = scmp.lt.s32.totalorder %s404_s14, %s404_s14 }
   0x7   :  { %p411_p3 = por %p410_p2, %p409_p1 }
   0x9   :  { %p412_p4 = pnand %p411_p3, %p405_p0 }
   0xb   :  { %415 = shalt.err (!%p412_p4)
}
   0xc   :  { %s483_s15 = smov 512   ;;  %s484_s16 = smov 32  }
   0xd   :  { %34 = dma.hbm_to_vmem [thread:$0]  %s534_s1, 8192, %s29_s13, [#allocation6], %s483_s15, %s483_s15, %s484_s16  }
   0xe   :  { %s485_s19 = smov [#allocation2]  }
   0xf   :  { %s16_s20 = sshll.u32 %s485_s19, 4  ;;  %s17_s20 = int_to_ptr.vmem [resolvable:$true] %s16_s20 }
  0x10   :  { %s424_s21 = scalar_lea.vmem %s17_s20, 256  ;;  %p429_p6 = scmp.lt.s32.totalorder %s17_s20, %s17_s20 }
  0x11   :  { %p425_p5 = scmp.ne.s32.totalorder %s17_s20, %s424_s21  ;;  %p430_p7 = scmp.lt.s32.totalorder %s424_s21, %s424_s21 }
  0x13   :  { %p431_p8 = por %p430_p7, %p429_p6 }
  0x15   :  { %p432_p9 = pnand %p431_p8, %p425_p5 }
  0x17   :  { %435 = shalt.err (!%p432_p9)
}
  0x18   :  { %s486_s22 = smov 128   ;;  %s487_s23 = smov 8  }
  0x19   :  { %22 = dma.hbm_to_vmem [thread:$0]  %s533_s0, 256, %s17_s20, [#allocation3], %s486_s22, %s486_s22, %s487_s23  }
  0x1a   :  { %s488_s26 = smov [#allocation7]  }
  0x1b   :  { %s41_s27 = sshll.u32 %s488_s26, 4  ;;  %s42_s27 = int_to_ptr.vmem [resolvable:$true] %s41_s27 }
  0x1c   :  { %s444_s1 = scalar_lea.vmem %s42_s27, 64  ;;  %p449_p11 = scmp.lt.s32.totalorder %s42_s27, %s42_s27 }
  0x1d   :  { %p445_p10 = scmp.ne.s32.totalorder %s42_s27, %s444_s1  ;;  %p450_p12 = scmp.lt.s32.totalorder %s444_s1, %s444_s1 }
  0x1f   :  { %p451_p13 = por %p450_p12, %p449_p11 }
  0x21   :  { %p452_p0 = pnand %p451_p13, %p445_p10 }
  0x23   :  { %455 = shalt.err (!%p452_p0)
}
  0x24   :  { %44 = dma.hbm_to_vmem [thread:$0]  %s535_s2, 64, %s42_s27, [#allocation6]  }
  0x25   :  { %476 = dma.done.wait [#allocation3], 256  }
  0x26   :  { %477 = vsyncadd [#allocation3], 4294967040 }
  0x27   :  { %478 = dma.done.wait [#allocation6], 8256  }
  0x28   :  { %479 = vsyncadd [#allocation6], 4294959040  ;;  %v489_v0 = vmov 0.0   ;;  %v120_v1 = vld [vmem:[#allocation5 + $0x1e8] sm:$0xff]  ;;  %v122_v2 = vld [vmem:[#allocation5 + $0x1f8] sm:$0xff]  ;;  %s490_s0 = smov [#allocation8]  }
  0x29   :  { %213 = vmatprep.mubr.f32.mxu0 %v489_v0  ;;  %290 = vmatprep.mubr.f32.mxu1 %v489_v0  ;;  %v119_v3 = vld [vmem:[#allocation5 + $0x1e0] sm:$0xff]  ;;  %v121_v4 = vld [vmem:[#allocation5 + $0x1f0] sm:$0xff]  ;;  %v116_v5 = vld [vmem:[#allocation5 + $0x1c8] sm:$0xff]  ;;  %s356_s2 = sshll.u32 %s490_s0, 4  ;;  %s357_s2 = int_to_ptr.vmem [resolvable:$true] %s356_s2 }
  0x2a   :  { %149 = vmatprep.subr.mxu0 %v120_v1  ;;  %226 = vmatprep.subr.mxu1 %v122_v2  ;;  %v118_v6 = vld [vmem:[#allocation5 + $0x1d8] sm:$0xff]  ;;  %v115_v7 = vld [vmem:[#allocation5 + $0x1c0] sm:$0xff]  ;;  %v117_v8 = vld [vmem:[#allocation5 + $0x1d0] sm:$0xff]  ;;  %s456_s30 = scalar_lea.vmem %s357_s2, 1024  ;;  %p461_p2 = scmp.lt.s32.totalorder %s357_s2, %s357_s2 }
  0x2b   :  { %150 = vmatpush1.msra.mxu0 %v119_v3  ;;  %227 = vmatpush1.msra.mxu1 %v121_v4  ;;  %v112_v9 = vld [vmem:[#allocation5 + $0x1a8] sm:$0xff]  ;;  %v114_v10 = vld [vmem:[#allocation5 + $0x1b8] sm:$0xff]  ;;  %v111_v11 = vld [vmem:[#allocation5 + $0x1a0] sm:$0xff]  ;;  %v129_v4 = vlaneseq  ;;  %p457_p1 = scmp.ne.s32.totalorder %s357_s2, %s456_s30  ;;  %p462_p3 = scmp.lt.s32.totalorder %s456_s30, %s456_s30 }
  0x2c   :  { %151 = vmatprep.subr.mxu0 %v116_v5  ;;  %228 = vmatprep.subr.mxu1 %v118_v6  ;;  %v113_v12 = vld [vmem:[#allocation5 + $0x1b0] sm:$0xff]  ;;  %v108_v13 = vld [vmem:[#allocation5 + $0x188] sm:$0xff]  ;;  %v110_v14 = vld [vmem:[#allocation5 + $0x198] sm:$0xff] }
  0x2d   :  { %152 = vmatpush1.msra.mxu0 %v115_v7  ;;  %229 = vmatpush1.msra.mxu1 %v117_v8  ;;  %v107_v15 = vld [vmem:[#allocation5 + $0x180] sm:$0xff]  ;;  %v109_v16 = vld [vmem:[#allocation5 + $0x190] sm:$0xff]  ;;  %v104_v17 = vld [vmem:[#allocation5 + $0x168] sm:$0xff]  ;;  %v130_v5 = vshrl.u32 %v129_v4, 7  ;;  %p463_p4 = por %p462_p3, %p461_p2 }
  0x2e   :  { %153 = vmatprep.subr.mxu0 %v112_v9  ;;  %230 = vmatprep.subr.mxu1 %v114_v10  ;;  %v106_v18 = vld [vmem:[#allocation5 + $0x178] sm:$0xff]  ;;  %v103_v19 = vld [vmem:[#allocation5 + $0x160] sm:$0xff]  ;;  %v105_v20 = vld [vmem:[#allocation5 + $0x170] sm:$0xff] }
  0x2f   :  { %154 = vmatpush1.msra.mxu0 %v111_v11  ;;  %231 = vmatpush1.msra.mxu1 %v113_v12  ;;  %v100_v21 = vld [vmem:[#allocation5 + $0x148] sm:$0xff]  ;;  %v102_v22 = vld [vmem:[#allocation5 + $0x158] sm:$0xff]  ;;  %v99_v23 = vld [vmem:[#allocation5 + $0x140] sm:$0xff]  ;;  %v131_v6 = vsub.s32 0, %v130_v5  ;;  %v139_v7 = vsub.s32 2, %v130_v5  ;;  %v135_v9 = vsub.s32 1, %v130_v5  ;;  %p464_p5 = pnand %p463_p4, %p457_p1 }
  0x30   :  { %155 = vmatprep.subr.mxu0 %v108_v13  ;;  %232 = vmatprep.subr.mxu1 %v110_v14  ;;  %v101_v24 = vld [vmem:[#allocation5 + $0x150] sm:$0xff]  ;;  %v96_v25 = vld [vmem:[#allocation5 + $0x128] sm:$0xff]  ;;  %v98_v26 = vld [vmem:[#allocation5 + $0x138] sm:$0xff]  ;;  %v143_v10 = vsub.s32 3, %v130_v5 }
  0x31   :  { %156 = vmatpush1.msra.mxu0 %v107_v15  ;;  %233 = vmatpush1.msra.mxu1 %v109_v16  ;;  %v95_v27 = vld [vmem:[#allocation5 + $0x120] sm:$0xff]  ;;  %v97_v28 = vld [vmem:[#allocation5 + $0x130] sm:$0xff]  ;;  %v92_v29 = vld [vmem:[#allocation5 + $0x108] sm:$0xff] }
  0x32   :  { %157 = vmatprep.subr.mxu0 %v104_v17  ;;  %234 = vmatprep.subr.mxu1 %v106_v18  ;;  %v94_v30 = vld [vmem:[#allocation5 + $0x118] sm:$0xff]  ;;  %v91_v31 = vld [vmem:[#allocation5 + $0x100] sm:$0xff]  ;;  %v93_v32 = vld [vmem:[#allocation5 + $0x110] sm:$0xff] }
  0x33   :  { %158 = vmatpush1.msra.mxu0 %v103_v19  ;;  %235 = vmatpush1.msra.mxu1 %v105_v20  ;;  %v88_v33 = vld [vmem:[#allocation5 + $0xe8] sm:$0xff]  ;;  %v90_v34 = vld [vmem:[#allocation5 + $0xf8] sm:$0xff]  ;;  %v87_v35 = vld [vmem:[#allocation5 + $0xe0] sm:$0xff] }
  0x34   :  { %159 = vmatprep.subr.mxu0 %v100_v21  ;;  %236 = vmatprep.subr.mxu1 %v102_v22  ;;  %v89_v36 = vld [vmem:[#allocation5 + $0xf0] sm:$0xff]  ;;  %v84_v37 = vld [vmem:[#allocation5 + $0xc8] sm:$0xff]  ;;  %v86_v38 = vld [vmem:[#allocation5 + $0xd8] sm:$0xff] }
  0x35   :  { %160 = vmatpush1.msra.mxu0 %v99_v23  ;;  %237 = vmatpush1.msra.mxu1 %v101_v24  ;;  %v83_v39 = vld [vmem:[#allocation5 + $0xc0] sm:$0xff]  ;;  %v85_v40 = vld [vmem:[#allocation5 + $0xd0] sm:$0xff]  ;;  %v80_v41 = vld [vmem:[#allocation5 + $0xa8] sm:$0xff] }
  0x36   :  { %161 = vmatprep.subr.mxu0 %v96_v25  ;;  %238 = vmatprep.subr.mxu1 %v98_v26  ;;  %v82_v42 = vld [vmem:[#allocation5 + $0xb8] sm:$0xff]  ;;  %v79_v43 = vld [vmem:[#allocation5 + $0xa0] sm:$0xff]  ;;  %v81_v44 = vld [vmem:[#allocation5 + $0xb0] sm:$0xff] }
  0x37   :  { %162 = vmatpush1.msra.mxu0 %v95_v27  ;;  %239 = vmatpush1.msra.mxu1 %v97_v28  ;;  %v76_v45 = vld [vmem:[#allocation5 + $0x88] sm:$0xff]  ;;  %v78_v46 = vld [vmem:[#allocation5 + $0x98] sm:$0xff]  ;;  %v75_v47 = vld [vmem:[#allocation5 + $0x80] sm:$0xff] }
  0x38   :  { %163 = vmatprep.subr.mxu0 %v92_v29  ;;  %240 = vmatprep.subr.mxu1 %v94_v30  ;;  %v77_v48 = vld [vmem:[#allocation5 + $0x90] sm:$0xff]  ;;  %v72_v49 = vld [vmem:[#allocation5 + $0x68] sm:$0xff]  ;;  %v74_v50 = vld [vmem:[#allocation5 + $0x78] sm:$0xff] }
  0x39   :  { %164 = vmatpush1.msra.mxu0 %v91_v31  ;;  %241 = vmatpush1.msra.mxu1 %v93_v32  ;;  %v71_v51 = vld [vmem:[#allocation5 + $0x60] sm:$0xff]  ;;  %v73_v52 = vld [vmem:[#allocation5 + $0x70] sm:$0xff]  ;;  %v68_v53 = vld [vmem:[#allocation5 + $0x48] sm:$0xff] }
  0x3a   :  { %165 = vmatprep.subr.mxu0 %v88_v33  ;;  %242 = vmatprep.subr.mxu1 %v90_v34  ;;  %v70_v54 = vld [vmem:[#allocation5 + $0x58] sm:$0xff]  ;;  %v67_v55 = vld [vmem:[#allocation5 + $0x40] sm:$0xff]  ;;  %v69_v56 = vld [vmem:[#allocation5 + $0x50] sm:$0xff] }
  0x3b   :  { %166 = vmatpush1.msra.mxu0 %v87_v35  ;;  %243 = vmatpush1.msra.mxu1 %v89_v36  ;;  %v64_v57 = vld [vmem:[#allocation5 + $0x28] sm:$0xff]  ;;  %v66_v58 = vld [vmem:[#allocation5 + $0x38] sm:$0xff]  ;;  %v63_v59 = vld [vmem:[#allocation5 + $0x20] sm:$0xff] }
  0x3c   :  { %167 = vmatprep.subr.mxu0 %v84_v37  ;;  %244 = vmatprep.subr.mxu1 %v86_v38  ;;  %v65_v60 = vld [vmem:[#allocation5 + $0x30] sm:$0xff]  ;;  %v60_v61 = vld [vmem:[#allocation5 + $0x8] sm:$0xff]  ;;  %v62_v62 = vld [vmem:[#allocation5 + $0x18] sm:$0xff] }
  0x3d   :  { %168 = vmatpush1.msra.mxu0 %v83_v39  ;;  %245 = vmatpush1.msra.mxu1 %v85_v40  ;;  %v59_v63 = vld [vmem:[#allocation5] sm:$0xff]  ;;  %v61_v1 = vld [vmem:[#allocation5 + $0x10] sm:$0xff]  ;;  %v124_v3 = vld [vmem:[#allocation2 + $0x8] sm:$0xff] }
  0x3e   :  { %169 = vmatprep.subr.mxu0 %v80_v41  ;;  %246 = vmatprep.subr.mxu1 %v82_v42  ;;  %v123_v2 = vld [vmem:[#allocation2] sm:$0xff]  ;;  %v127_v8 = vld [vmem:[#allocation7] sm:$0xf] }
  0x3f   :  { %170 = vmatpush1.msra.mxu0 %v79_v43  ;;  %247 = vmatpush1.msra.mxu1 %v81_v44  ;;  %v132_v11 = vrot.slane %v127_v8, %v131_v6  ;;  %v140_v12 = vrot.slane %v127_v8, %v139_v7  ;;  %v136_v15 = vrot.slane %v127_v8, %v135_v9 }
  0x40   :  { %171 = vmatprep.subr.mxu0 %v76_v45  ;;  %248 = vmatprep.subr.mxu1 %v78_v46  ;;  %v144_v16 = vrot.slane %v127_v8, %v143_v10 }
  0x41   :  { %172 = vmatpush1.msra.mxu0 %v75_v47  ;;  %249 = vmatpush1.msra.mxu1 %v77_v48 }
  0x42   :  { %173 = vmatprep.subr.mxu0 %v72_v49  ;;  %250 = vmatprep.subr.mxu1 %v74_v50 }
  0x43   :  { %174 = vmatpush1.msra.mxu0 %v71_v51  ;;  %251 = vmatpush1.msra.mxu1 %v73_v52 }
  0x44   :  { %175 = vmatprep.subr.mxu0 %v68_v53  ;;  %252 = vmatprep.subr.mxu1 %v70_v54 }
  0x45   :  { %176 = vmatpush1.msra.mxu0 %v67_v55  ;;  %253 = vmatpush1.msra.mxu1 %v69_v56 }
  0x46   :  { %177 = vmatprep.subr.mxu0 %v64_v57  ;;  %254 = vmatprep.subr.mxu1 %v66_v58 }
  0x47   :  { %178 = vmatpush1.msra.mxu0 %v63_v59  ;;  %255 = vmatpush1.msra.mxu1 %v65_v60 }
  0x48   :  { %179 = vmatprep.subr.mxu0 %v60_v61  ;;  %256 = vmatprep.subr.mxu1 %v62_v62 }
  0x49   :  { %180 = vmatpush1.msra.mxu0 %v59_v63  ;;  %257 = vmatpush1.msra.mxu1 %v61_v1 }
  0x4a   :  { %214 = vmatmul.mubr.f32.vlgmr.msra.gmra.mxu0 %v123_v2  ;;  %291 = vmatmul.mubr.f32.vlgmr.msra.gmra.mxu1 %v123_v2 }
  0x4b   :  { %219 = vmatprep.mubr.f32.mxu0 %v489_v0  ;;  %296 = vmatprep.mubr.f32.mxu1 %v489_v0 }
  0x4e   :  { %220 = vmatmul.mubr.f32.gmra.mxu0 %v124_v3  ;;  %297 = vmatmul.mubr.f32.gmra.mxu1 %v124_v3 }
 0x10a   :  { %v215_v13 = vpop.f32.mrf.mxu0  ;;  %v292_v14 = vpop.f32.mrf.mxu1 }
 0x10b   :  { %v216_v17 = vadd.f32 %v215_v13, %v132_v11  ;;  %v293_v18 = vadd.f32 %v292_v14, %v140_v12 }
 0x10c   :  { %v217_v19 = vpop.f32.mrf.mxu0  ;;  %v294_v0 = vpop.f32.mrf.mxu1 }
 0x10d   :  { %v311_v20 = vmul.f32 0.70710677, %v216_v17  ;;  %v313_v21 = vmul.f32 0.70710677, %v293_v18  ;;  %v218_v22 = vadd.f32 %v217_v19, %v136_v15  ;;  %v295_v23 = vadd.f32 %v294_v0, %v144_v16 }
 0x10e   :  { %v221_v24 = vpop.f32.mrf.mxu0  ;;  %v298_v25 = vpop.f32.mrf.mxu1  ;;  %v303_v40 = vmul.f32 0.5, %v216_v17  ;;  %v305_v42 = vmul.f32 0.5, %v293_v18 }
 0x10f   :  { %380 = verf.f32 %v311_v20  ;;  %v222_v26 = vadd.f32 %v221_v24, %v132_v11  ;;  %v299_v27 = vadd.f32 %v298_v25, %v140_v12  ;;  %v312_v28 = vmul.f32 0.70710677, %v218_v22 }
 0x110   :  { %382 = verf.f32 %v313_v21  ;;  %v223_v29 = vpop.f32.mrf.mxu0  ;;  %v300_v30 = vpop.f32.mrf.mxu1  ;;  %v314_v31 = vmul.f32 0.70710677, %v295_v23  ;;  %v304_v48 = vmul.f32 0.5, %v218_v22  ;;  %v306_v51 = vmul.f32 0.5, %v295_v23 }
 0x111   :  { %v315_v32 = vmul.f32 0.70710677, %v222_v26  ;;  %384 = verf.f32 %v312_v28  ;;  %v317_v33 = vmul.f32 0.70710677, %v299_v27  ;;  %v224_v34 = vadd.f32 %v223_v29, %v136_v15 }
 0x112   :  { %v301_v35 = vadd.f32 %v300_v30, %v144_v16  ;;  %386 = verf.f32 %v314_v31  ;;  %v307_v55 = vmul.f32 0.5, %v222_v26  ;;  %v309_v59 = vmul.f32 0.5, %v299_v27 }
 0x113   :  { %388 = verf.f32 %v315_v32  ;;  %v316_v36 = vmul.f32 0.70710677, %v224_v34  ;;  %v308_v63 = vmul.f32 0.5, %v224_v34 }
 0x114   :  { %390 = verf.f32 %v317_v33  ;;  %v318_v37 = vmul.f32 0.70710677, %v301_v35  ;;  %v310_v3 = vmul.f32 0.5, %v301_v35 }
 0x115   :  { %392 = verf.f32 %v316_v36 }
 0x116   :  { %394 = verf.f32 %v318_v37 }
 0x11c   :  { %v381_v38 = vpop.eup %380 }
 0x11d   :  { %v383_v39 = vpop.eup %382  ;;  %v327_v41 = vadd.f32 1.0, %v381_v38 }
 0x11e   :  { %v329_v43 = vadd.f32 1.0, %v383_v39  ;;  %v385_v44 = vpop.eup %384 }
 0x11f   :  { %v335_v45 = vmul.f32 %v327_v41, %v303_v40  ;;  %v387_v46 = vpop.eup %386  ;;  %v328_v49 = vadd.f32 1.0, %v385_v44 }
 0x120   :  { %v337_v47 = vmul.f32 %v329_v43, %v305_v42  ;;  %v389_v50 = vpop.eup %388  ;;  %v330_v52 = vadd.f32 1.0, %v387_v46 }
 0x121   :  { %343 = vst [vmem:[#allocation8] sm:$0xff] %v335_v45  ;;  %v391_v53 = vpop.eup %390  ;;  %v336_v54 = vmul.f32 %v328_v49, %v304_v48  ;;  %v331_v56 = vadd.f32 1.0, %v389_v50 }
 0x122   :  { %345 = vst [vmem:[#allocation8 + $0x10] sm:$0xff] %v337_v47  ;;  %v393_v57 = vpop.eup %392  ;;  %v338_v58 = vmul.f32 %v330_v52, %v306_v51  ;;  %v333_v60 = vadd.f32 1.0, %v391_v53 }
 0x123   :  { %v395_v61 = vpop.eup %394  ;;  %344 = vst [vmem:[#allocation8 + $0x8] sm:$0xff] %v336_v54  ;;  %v339_v62 = vmul.f32 %v331_v56, %v307_v55  ;;  %v332_v1 = vadd.f32 1.0, %v393_v57 }
 0x124   :  { %346 = vst [vmem:[#allocation8 + $0x18] sm:$0xff] %v338_v58  ;;  %v341_v2 = vmul.f32 %v333_v60, %v309_v59  ;;  %v334_v4 = vadd.f32 1.0, %v395_v61 }
 0x125   :  { %347 = vst [vmem:[#allocation8 + $0x20] sm:$0xff] %v339_v62  ;;  %v340_v5 = vmul.f32 %v332_v1, %v308_v63 }
 0x126   :  { %349 = vst [vmem:[#allocation8 + $0x30] sm:$0xff] %v341_v2  ;;  %v342_v6 = vmul.f32 %v334_v4, %v310_v3 }
 0x127   :  { %348 = vst [vmem:[#allocation8 + $0x28] sm:$0xff] %v340_v5 }
 0x128   :  { %350 = vst [vmem:[#allocation8 + $0x38] sm:$0xff] %v342_v6 }
 0x129   :  { %467 = shalt.err (!%p464_p5)
}
 0x12a   :  { %362 = dma.vmem_to_hbm [thread:$0]  %s357_s2, 1024, %s536_s3, [#allocation4], %s483_s15, %s483_s15, %s484_s16  }
 0x12b   :  { %480 = dma.done.wait [#allocation4], 1024  }
 0x12c   :  { %481 = vsyncadd [#allocation4], 4294966272 }
 0x12d   :  { %366 = vsyncpa [#allocation3], 1 }
 0x12e   :  { %367 = vsyncpa [#allocation6], 1 }
 0x12f   :  { %368 = vsyncpa [#allocation4], 1 }

// kernel: tpu_custom_call.1
= control target key start
LH: loop header
LB: loop body
LE: loop exit
PB: predicated region body
PF: predicated region fallthrough
CT: control target
= control target key end

     0   :  { %8 = vsyncpa [#allocation3], 0  ;;  %s533_s0 = inlined_call_operand.hbm [shape: f32[16,128], index: 0, kind: input, shape index: {}]   ;;  %s534_s1 = inlined_call_operand.hbm [shape: f32[128,512], index: 1, kind: input, shape index: {}]   ;;  %s535_s2 = inlined_call_operand.hbm [shape: f32[1,512], index: 2, kind: input, shape index: {}]   ;;  %s536_s3 = inlined_call_operand.hbm [shape: f32[16,512], index: 3, kind: output, shape index: {}]  }
   0x1   :  { %9 = vsyncpa [#allocation6], 0 }
   0x2   :  { %10 = vsyncpa [#allocation4], 0  ;;  %s482_s12 = smov [#allocation5]  }
   0x3   :  { %s28_s13 = sshll.u32 %s482_s12, 4  ;;  %s29_s13 = int_to_ptr.vmem [resolvable:$true] %s28_s13 }
   0x4   :  { %s404_s14 = scalar_lea.vmem %s29_s13, 8192  ;;  %p409_p1 = scmp.lt.s32.totalorder %s29_s13, %s29_s13 }
   0x5   :  { %p405_p0 = scmp.ne.s32.totalorder %s29_s13, %s404_s14  ;;  %p410_p2 = scmp.lt.s32.totalorder %s404_s14, %s404_s14 }
   0x7   :  { %p411_p3 = por %p410_p2, %p409_p1 }
   0x9   :  { %p412_p4 = pnand %p411_p3, %p405_p0 }
   0xb   :  { %415 = shalt.err (!%p412_p4)
}
   0xc   :  { %s483_s15 = smov 512   ;;  %s484_s16 = smov 32  }
   0xd   :  { %34 = dma.hbm_to_vmem [thread:$0]  %s534_s1, 8192, %s29_s13, [#allocation6], %s483_s15, %s483_s15, %s484_s16  }
   0xe   :  { %s485_s19 = smov [#allocation2]  }
   0xf   :  { %s16_s20 = sshll.u32 %s485_s19, 4  ;;  %s17_s20 = int_to_ptr.vmem [resolvable:$true] %s16_s20 }
  0x10   :  { %s424_s21 = scalar_lea.vmem %s17_s20, 256  ;;  %p429_p6 = scmp.lt.s32.totalorder %s17_s20, %s17_s20 }
  0x11   :  { %p425_p5 = scmp.ne.s32.totalorder %s17_s20, %s424_s21  ;;  %p430_p7 = scmp.lt.s32.totalorder %s424_s21, %s424_s21 }
  0x13   :  { %p431_p8 = por %p430_p7, %p429_p6 }
  0x15   :  { %p432_p9 = pnand %p431_p8, %p425_p5 }
  0x17   :  { %435 = shalt.err (!%p432_p9)
}
  0x18   :  { %s486_s22 = smov 128   ;;  %s487_s23 = smov 8  }
  0x19   :  { %22 = dma.hbm_to_vmem [thread:$0]  %s533_s0, 256, %s17_s20, [#allocation3], %s486_s22, %s486_s22, %s487_s23  }
  0x1a   :  { %s488_s26 = smov [#allocation7]  }
  0x1b   :  { %s41_s27 = sshll.u32 %s488_s26, 4  ;;  %s42_s27 = int_to_ptr.vmem [resolvable:$true] %s41_s27 }
  0x1c   :  { %s444_s1 = scalar_lea.vmem %s42_s27, 64  ;;  %p449_p11 = scmp.lt.s32.totalorder %s42_s27, %s42_s27 }
  0x1d   :  { %p445_p10 = scmp.ne.s32.totalorder %s42_s27, %s444_s1  ;;  %p450_p12 = scmp.lt.s32.totalorder %s444_s1, %s444_s1 }
  0x1f   :  { %p451_p13 = por %p450_p12, %p449_p11 }
  0x21   :  { %p452_p0 = pnand %p451_p13, %p445_p10 }
  0x23   :  { %455 = shalt.err (!%p452_p0)
}
  0x24   :  { %44 = dma.hbm_to_vmem [thread:$0]  %s535_s2, 64, %s42_s27, [#allocation6]  }
  0x25   :  { %476 = dma.done.wait [#allocation3], 256  }
  0x26   :  { %477 = vsyncadd [#allocation3], 4294967040 }
  0x27   :  { %478 = dma.done.wait [#allocation6], 8256  }
  0x28   :  { %479 = vsyncadd [#allocation6], 4294959040  ;;  %v489_v0 = vmov 0.0   ;;  %v120_v1 = vld [vmem:[#allocation5 + $0x1e8] sm:$0xff]  ;;  %v122_v2 = vld [vmem:[#allocation5 + $0x1f8] sm:$0xff]  ;;  %s490_s0 = smov [#allocation8]  }
  0x29   :  { %213 = vmatprep.mubr.f32.mxu0 %v489_v0  ;;  %290 = vmatprep.mubr.f32.mxu1 %v489_v0  ;;  %v119_v3 = vld [vmem:[#allocation5 + $0x1e0] sm:$0xff]  ;;  %v121_v4 = vld [vmem:[#allocation5 + $0x1f0] sm:$0xff]  ;;  %v116_v5 = vld [vmem:[#allocation5 + $0x1c8] sm:$0xff]  ;;  %s356_s2 = sshll.u32 %s490_s0, 4  ;;  %s357_s2 = int_to_ptr.vmem [resolvable:$true] %s356_s2 }
  0x2a   :  { %149 = vmatprep.subr.mxu0 %v120_v1  ;;  %226 = vmatprep.subr.mxu1 %v122_v2  ;;  %v118_v6 = vld [vmem:[#allocation5 + $0x1d8] sm:$0xff]  ;;  %v115_v7 = vld [vmem:[#allocation5 + $0x1c0] sm:$0xff]  ;;  %v117_v8 = vld [vmem:[#allocation5 + $0x1d0] sm:$0xff]  ;;  %s456_s30 = scalar_lea.vmem %s357_s2, 1024  ;;  %p461_p2 = scmp.lt.s32.totalorder %s357_s2, %s357_s2 }
  0x2b   :  { %150 = vmatpush1.msra.mxu0 %v119_v3  ;;  %227 = vmatpush1.msra.mxu1 %v121_v4  ;;  %v112_v9 = vld [vmem:[#allocation5 + $0x1a8] sm:$0xff]  ;;  %v114_v10 = vld [vmem:[#allocation5 + $0x1b8] sm:$0xff]  ;;  %v111_v11 = vld [vmem:[#allocation5 + $0x1a0] sm:$0xff]  ;;  %v129_v4 = vlaneseq  ;;  %p457_p1 = scmp.ne.s32.totalorder %s357_s2, %s456_s30  ;;  %p462_p3 = scmp.lt.s32.totalorder %s456_s30, %s456_s30 }
  0x2c   :  { %151 = vmatprep.subr.mxu0 %v116_v5  ;;  %228 = vmatprep.subr.mxu1 %v118_v6  ;;  %v113_v12 = vld [vmem:[#allocation5 + $0x1b0] sm:$0xff]  ;;  %v108_v13 = vld [vmem:[#allocation5 + $0x188] sm:$0xff]  ;;  %v110_v14 = vld [vmem:[#allocation5 + $0x198] sm:$0xff] }
  0x2d   :  { %152 = vmatpush1.msra.mxu0 %v115_v7  ;;  %229 = vmatpush1.msra.mxu1 %v117_v8  ;;  %v107_v15 = vld [vmem:[#allocation5 + $0x180] sm:$0xff]  ;;  %v109_v16 = vld [vmem:[#allocation5 + $0x190] sm:$0xff]  ;;  %v104_v17 = vld [vmem:[#allocation5 + $0x168] sm:$0xff]  ;;  %v130_v5 = vshrl.u32 %v129_v4, 7  ;;  %p463_p4 = por %p462_p3, %p461_p2 }
  0x2e   :  { %153 = vmatprep.subr.mxu0 %v112_v9  ;;  %230 = vmatprep.subr.mxu1 %v114_v10  ;;  %v106_v18 = vld [vmem:[#allocation5 + $0x178] sm:$0xff]  ;;  %v103_v19 = vld [vmem:[#allocation5 + $0x160] sm:$0xff]  ;;  %v105_v20 = vld [vmem:[#allocation5 + $0x170] sm:$0xff] }
  0x2f   :  { %154 = vmatpush1.msra.mxu0 %v111_v11  ;;  %231 = vmatpush1.msra.mxu1 %v113_v12  ;;  %v100_v21 = vld [vmem:[#allocation5 + $0x148] sm:$0xff]  ;;  %v102_v22 = vld [vmem:[#allocation5 + $0x158] sm:$0xff]  ;;  %v99_v23 = vld [vmem:[#allocation5 + $0x140] sm:$0xff]  ;;  %v131_v6 = vsub.s32 0, %v130_v5  ;;  %v139_v7 = vsub.s32 2, %v130_v5  ;;  %v135_v9 = vsub.s32 1, %v130_v5  ;;  %p464_p5 = pnand %p463_p4, %p457_p1 }
  0x30   :  { %155 = vmatprep.subr.mxu0 %v108_v13  ;;  %232 = vmatprep.subr.mxu1 %v110_v14  ;;  %v101_v24 = vld [vmem:[#allocation5 + $0x150] sm:$0xff]  ;;  %v96_v25 = vld [vmem:[#allocation5 + $0x128] sm:$0xff]  ;;  %v98_v26 = vld [vmem:[#allocation5 + $0x138] sm:$0xff]  ;;  %v143_v10 = vsub.s32 3, %v130_v5 }
  0x31   :  { %156 = vmatpush1.msra.mxu0 %v107_v15  ;;  %233 = vmatpush1.msra.mxu1 %v109_v16  ;;  %v95_v27 = vld [vmem:[#allocation5 + $0x120] sm:$0xff]  ;;  %v97_v28 = vld [vmem:[#allocation5 + $0x130] sm:$0xff]  ;;  %v92_v29 = vld [vmem:[#allocation5 + $0x108] sm:$0xff] }
  0x32   :  { %157 = vmatprep.subr.mxu0 %v104_v17  ;;  %234 = vmatprep.subr.mxu1 %v106_v18  ;;  %v94_v30 = vld [vmem:[#allocation5 + $0x118] sm:$0xff]  ;;  %v91_v31 = vld [vmem:[#allocation5 + $0x100] sm:$0xff]  ;;  %v93_v32 = vld [vmem:[#allocation5 + $0x110] sm:$0xff] }
  0x33   :  { %158 = vmatpush1.msra.mxu0 %v103_v19  ;;  %235 = vmatpush1.msra.mxu1 %v105_v20  ;;  %v88_v33 = vld [vmem:[#allocation5 + $0xe8] sm:$0xff]  ;;  %v90_v34 = vld [vmem:[#allocation5 + $0xf8] sm:$0xff]  ;;  %v87_v35 = vld [vmem:[#allocation5 + $0xe0] sm:$0xff] }
  0x34   :  { %159 = vmatprep.subr.mxu0 %v100_v21  ;;  %236 = vmatprep.subr.mxu1 %v102_v22  ;;  %v89_v36 = vld [vmem:[#allocation5 + $0xf0] sm:$0xff]  ;;  %v84_v37 = vld [vmem:[#allocation5 + $0xc8] sm:$0xff]  ;;  %v86_v38 = vld [vmem:[#allocation5 + $0xd8] sm:$0xff] }
  0x35   :  { %160 = vmatpush1.msra.mxu0 %v99_v23  ;;  %237 = vmatpush1.msra.mxu1 %v101_v24  ;;  %v83_v39 = vld [vmem:[#allocation5 + $0xc0] sm:$0xff]  ;;  %v85_v40 = vld [vmem:[#allocation5 + $0xd0] sm:$0xff]  ;;  %v80_v41 = vld [vmem:[#allocation5 + $0xa8] sm:$0xff] }
  0x36   :  { %161 = vmatprep.subr.mxu0 %v96_v25  ;;  %238 = vmatprep.subr.mxu1 %v98_v26  ;;  %v82_v42 = vld [vmem:[#allocation5 + $0xb8] sm:$0xff]  ;;  %v79_v43 = vld [vmem:[#allocation5 + $0xa0] sm:$0xff]  ;;  %v81_v44 = vld [vmem:[#allocation5 + $0xb0] sm:$0xff] }
  0x37   :  { %162 = vmatpush1.msra.mxu0 %v95_v27  ;;  %239 = vmatpush1.msra.mxu1 %v97_v28  ;;  %v76_v45 = vld [vmem:[#allocation5 + $0x88] sm:$0xff]  ;;  %v78_v46 = vld [vmem:[#allocation5 + $0x98] sm:$0xff]  ;;  %v75_v47 = vld [vmem:[#allocation5 + $0x80] sm:$0xff] }
  0x38   :  { %163 = vmatprep.subr.mxu0 %v92_v29  ;;  %240 = vmatprep.subr.mxu1 %v94_v30  ;;  %v77_v48 = vld [vmem:[#allocation5 + $0x90] sm:$0xff]  ;;  %v72_v49 = vld [vmem:[#allocation5 + $0x68] sm:$0xff]  ;;  %v74_v50 = vld [vmem:[#allocation5 + $0x78] sm:$0xff] }
  0x39   :  { %164 = vmatpush1.msra.mxu0 %v91_v31  ;;  %241 = vmatpush1.msra.mxu1 %v93_v32  ;;  %v71_v51 = vld [vmem:[#allocation5 + $0x60] sm:$0xff]  ;;  %v73_v52 = vld [vmem:[#allocation5 + $0x70] sm:$0xff]  ;;  %v68_v53 = vld [vmem:[#allocation5 + $0x48] sm:$0xff] }
  0x3a   :  { %165 = vmatprep.subr.mxu0 %v88_v33  ;;  %242 = vmatprep.subr.mxu1 %v90_v34  ;;  %v70_v54 = vld [vmem:[#allocation5 + $0x58] sm:$0xff]  ;;  %v67_v55 = vld [vmem:[#allocation5 + $0x40] sm:$0xff]  ;;  %v69_v56 = vld [vmem:[#allocation5 + $0x50] sm:$0xff] }
  0x3b   :  { %166 = vmatpush1.msra.mxu0 %v87_v35  ;;  %243 = vmatpush1.msra.mxu1 %v89_v36  ;;  %v64_v57 = vld [vmem:[#allocation5 + $0x28] sm:$0xff]  ;;  %v66_v58 = vld [vmem:[#allocation5 + $0x38] sm:$0xff]  ;;  %v63_v59 = vld [vmem:[#allocation5 + $0x20] sm:$0xff] }
  0x3c   :  { %167 = vmatprep.subr.mxu0 %v84_v37  ;;  %244 = vmatprep.subr.mxu1 %v86_v38  ;;  %v65_v60 = vld [vmem:[#allocation5 + $0x30] sm:$0xff]  ;;  %v60_v61 = vld [vmem:[#allocation5 + $0x8] sm:$0xff]  ;;  %v62_v62 = vld [vmem:[#allocation5 + $0x18] sm:$0xff] }
  0x3d   :  { %168 = vmatpush1.msra.mxu0 %v83_v39  ;;  %245 = vmatpush1.msra.mxu1 %v85_v40  ;;  %v59_v63 = vld [vmem:[#allocation5] sm:$0xff]  ;;  %v61_v1 = vld [vmem:[#allocation5 + $0x10] sm:$0xff]  ;;  %v124_v3 = vld [vmem:[#allocation2 + $0x8] sm:$0xff] }
  0x3e   :  { %169 = vmatprep.subr.mxu0 %v80_v41  ;;  %246 = vmatprep.subr.mxu1 %v82_v42  ;;  %v123_v2 = vld [vmem:[#allocation2] sm:$0xff]  ;;  %v127_v8 = vld [vmem:[#allocation7] sm:$0xf] }
  0x3f   :  { %170 = vmatpush1.msra.mxu0 %v79_v43  ;;  %247 = vmatpush1.msra.mxu1 %v81_v44  ;;  %v132_v11 = vrot.slane %v127_v8, %v131_v6  ;;  %v140_v12 = vrot.slane %v127_v8, %v139_v7  ;;  %v136_v15 = vrot.slane %v127_v8, %v135_v9 }
  0x40   :  { %171 = vmatprep.subr.mxu0 %v76_v45  ;;  %248 = vmatprep.subr.mxu1 %v78_v46  ;;  %v144_v16 = vrot.slane %v127_v8, %v143_v10 }
  0x41   :  { %172 = vmatpush1.msra.mxu0 %v75_v47  ;;  %249 = vmatpush1.msra.mxu1 %v77_v48 }
  0x42   :  { %173 = vmatprep.subr.mxu0 %v72_v49  ;;  %250 = vmatprep.subr.mxu1 %v74_v50 }
  0x43   :  { %174 = vmatpush1.msra.mxu0 %v71_v51  ;;  %251 = vmatpush1.msra.mxu1 %v73_v52 }
  0x44   :  { %175 = vmatprep.subr.mxu0 %v68_v53  ;;  %252 = vmatprep.subr.mxu1 %v70_v54 }
  0x45   :  { %176 = vmatpush1.msra.mxu0 %v67_v55  ;;  %253 = vmatpush1.msra.mxu1 %v69_v56 }
  0x46   :  { %177 = vmatprep.subr.mxu0 %v64_v57  ;;  %254 = vmatprep.subr.mxu1 %v66_v58 }
  0x47   :  { %178 = vmatpush1.msra.mxu0 %v63_v59  ;;  %255 = vmatpush1.msra.mxu1 %v65_v60 }
  0x48   :  { %179 = vmatprep.subr.mxu0 %v60_v61  ;;  %256 = vmatprep.subr.mxu1 %v62_v62 }
  0x49   :  { %180 = vmatpush1.msra.mxu0 %v59_v63  ;;  %257 = vmatpush1.msra.mxu1 %v61_v1 }
  0x4a   :  { %214 = vmatmul.mubr.f32.vlgmr.msra.gmra.mxu0 %v123_v2  ;;  %291 = vmatmul.mubr.f32.vlgmr.msra.gmra.mxu1 %v123_v2 }
  0x4b   :  { %219 = vmatprep.mubr.f32.mxu0 %v489_v0  ;;  %296 = vmatprep.mubr.f32.mxu1 %v489_v0 }
  0x4e   :  { %220 = vmatmul.mubr.f32.gmra.mxu0 %v124_v3  ;;  %297 = vmatmul.mubr.f32.gmra.mxu1 %v124_v3 }
 0x10a   :  { %v215_v13 = vpop.f32.mrf.mxu0  ;;  %v292_v14 = vpop.f32.mrf.mxu1 }
 0x10b   :  { %v216_v17 = vadd.f32 %v215_v13, %v132_v11  ;;  %v293_v18 = vadd.f32 %v292_v14, %v140_v12 }
 0x10c   :  { %v217_v19 = vpop.f32.mrf.mxu0  ;;  %v294_v0 = vpop.f32.mrf.mxu1 }
 0x10d   :  { %v311_v20 = vmul.f32 0.70710677, %v216_v17  ;;  %v313_v21 = vmul.f32 0.70710677, %v293_v18  ;;  %v218_v22 = vadd.f32 %v217_v19, %v136_v15  ;;  %v295_v23 = vadd.f32 %v294_v0, %v144_v16 }
 0x10e   :  { %v221_v24 = vpop.f32.mrf.mxu0  ;;  %v298_v25 = vpop.f32.mrf.mxu1  ;;  %v303_v40 = vmul.f32 0.5, %v216_v17  ;;  %v305_v42 = vmul.f32 0.5, %v293_v18 }
 0x10f   :  { %380 = verf.f32 %v311_v20  ;;  %v222_v26 = vadd.f32 %v221_v24, %v132_v11  ;;  %v299_v27 = vadd.f32 %v298_v25, %v140_v12  ;;  %v312_v28 = vmul.f32 0.70710677, %v218_v22 }
 0x110   :  { %382 = verf.f32 %v313_v21  ;;  %v223_v29 = vpop.f32.mrf.mxu0  ;;  %v300_v30 = vpop.f32.mrf.mxu1  ;;  %v314_v31 = vmul.f32 0.70710677, %v295_v23  ;;  %v304_v48 = vmul.f32 0.5, %v218_v22  ;;  %v306_v51 = vmul.f32 0.5, %v295_v23 }
 0x111   :  { %v315_v32 = vmul.f32 0.70710677, %v222_v26  ;;  %384 = verf.f32 %v312_v28  ;;  %v317_v33 = vmul.f32 0.70710677, %v299_v27  ;;  %v224_v34 = vadd.f32 %v223_v29, %v136_v15 }
 0x112   :  { %v301_v35 = vadd.f32 %v300_v30, %v144_v16  ;;  %386 = verf.f32 %v314_v31  ;;  %v307_v55 = vmul.f32 0.5, %v222_v26  ;;  %v309_v59 = vmul.f32 0.5, %v299_v27 }
 0x113   :  { %388 = verf.f32 %v315_v32  ;;  %v316_v36 = vmul.f32 0.70710677, %v224_v34  ;;  %v308_v63 = vmul.f32 0.5, %v224_v34 }
 0x114   :  { %390 = verf.f32 %v317_v33  ;;  %v318_v37 = vmul.f32 0.70710677, %v301_v35  ;;  %v310_v3 = vmul.f32 0.5, %v301_v35 }
 0x115   :  { %392 = verf.f32 %v316_v36 }
 0x116   :  { %394 = verf.f32 %v318_v37 }
 0x11c   :  { %v381_v38 = vpop.eup %380 }
 0x11d   :  { %v383_v39 = vpop.eup %382  ;;  %v327_v41 = vadd.f32 1.0, %v381_v38 }
 0x11e   :  { %v329_v43 = vadd.f32 1.0, %v383_v39  ;;  %v385_v44 = vpop.eup %384 }
 0x11f   :  { %v335_v45 = vmul.f32 %v327_v41, %v303_v40  ;;  %v387_v46 = vpop.eup %386  ;;  %v328_v49 = vadd.f32 1.0, %v385_v44 }
 0x120   :  { %v337_v47 = vmul.f32 %v329_v43, %v305_v42  ;;  %v389_v50 = vpop.eup %388  ;;  %v330_v52 = vadd.f32 1.0, %v387_v46 }
 0x121   :  { %343 = vst [vmem:[#allocation8] sm:$0xff] %v335_v45  ;;  %v391_v53 = vpop.eup %390  ;;  %v336_v54 = vmul.f32 %v328_v49, %v304_v48  ;;  %v331_v56 = vadd.f32 1.0, %v389_v50 }
 0x122   :  { %345 = vst [vmem:[#allocation8 + $0x10] sm:$0xff] %v337_v47  ;;  %v393_v57 = vpop.eup %392  ;;  %v338_v58 = vmul.f32 %v330_v52, %v306_v51  ;;  %v333_v60 = vadd.f32 1.0, %v391_v53 }
 0x123   :  { %v395_v61 = vpop.eup %394  ;;  %344 = vst [vmem:[#allocation8 + $0x8] sm:$0xff] %v336_v54  ;;  %v339_v62 = vmul.f32 %v331_v56, %v307_v55  ;;  %v332_v1 = vadd.f32 1.0, %v393_v57 }
 0x124   :  { %346 = vst [vmem:[#allocation8 + $0x18] sm:$0xff] %v338_v58  ;;  %v341_v2 = vmul.f32 %v333_v60, %v309_v59  ;;  %v334_v4 = vadd.f32 1.0, %v395_v61 }
 0x125   :  { %347 = vst [vmem:[#allocation8 + $0x20] sm:$0xff] %v339_v62  ;;  %v340_v5 = vmul.f32 %v332_v1, %v308_v63 }
 0x126   :  { %349 = vst [vmem:[#allocation8 + $0x30] sm:$0xff] %v341_v2  ;;  %v342_v6 = vmul.f32 %v334_v4, %v310_v3 }
 0x127   :  { %348 = vst [vmem:[#allocation8 + $0x28] sm:$0xff] %v340_v5 }
 0x128   :  { %350 = vst [vmem:[#allocation8 + $0x38] sm:$0xff] %v342_v6 }
 0x129   :  { %467 = shalt.err (!%p464_p5)
}
 0x12a   :  { %362 = dma.vmem_to_hbm [thread:$0]  %s357_s2, 1024, %s536_s3, [#allocation4], %s483_s15, %s483_s15, %s484_s16  }
 0x12b   :  { %480 = dma.done.wait [#allocation4], 1024  }
 0x12c   :  { %481 = vsyncadd [#allocation4], 4294966272 }
 0x12d   :  { %366 = vsyncpa [#allocation3], 1 }
 0x12e   :  { %367 = vsyncpa [#allocation6], 1 }
 0x12f   :  { %368 = vsyncpa [#allocation4], 1 }

</bundles_post_ra>
